<compile_context>
chip_gen: v6e
topology: v6e:2x2x1
jax: 0.10.0
libtpu: 0.0.40
codegen_flags: <defaults>
</compile_context>

<pallas_src>
import functools
import math

import jax
import jax.numpy as jnp
from jax.experimental import pallas as pl
from jax.experimental.pallas import tpu as pltpu


def _round_up(x, m):
    return (x + m - 1) // m * m


def _pad_axis(arr, axis, target):
    pad = target - arr.shape[axis]
    if pad == 0:
        return arr
    widths = [(0, 0)] * arr.ndim
    widths[axis] = (0, pad)
    return jnp.pad(arr, widths)


# --------------------------- per-layer feature transform -------------------------------
def _feat_transform_kernel(x_ref, wn_ref, ws_sum_ref, b_sum_ref, hw_ref, selfb_ref):
    """grid = (dst_tiles, relations).
    hw[r]    = X @ W_neigh[r]                       (bf16, fed to the aggregation kernel)
    selfb    = X @ sum_r(W_self[r]) + sum_r(bias)   (f32, hoisted self term, written at r==0)
    """
    r = pl.program_id(1)
    x = x_ref[...]                                               # (tm, fin_p) bf16
    hw_ref[...] = jnp.dot(x, wn_ref[...],
                          preferred_element_type=jnp.float32).astype(hw_ref.dtype)

    @pl.when(r == 0)
    def _():
        selfb_ref[...] = (jnp.dot(x, ws_sum_ref[...],
                                  preferred_element_type=jnp.float32)
                          + b_sum_ref[...])


def feature_transform(x_b, wn, ws_sum, b_sum, *, tm):
    n_pad, fin_p = x_b.shape
    R, _, fout_p = wn.shape
    return pl.pallas_call(
        _feat_transform_kernel,
        out_shape=(jax.ShapeDtypeStruct((R, n_pad, fout_p), jnp.bfloat16),
                   jax.ShapeDtypeStruct((n_pad, fout_p), jnp.float32)),
        grid_spec=pltpu.PrefetchScalarGridSpec(
            num_scalar_prefetch=0,
            grid=(n_pad // tm, R),
            in_specs=[
                pl.BlockSpec((tm, fin_p), lambda m, r: (m, 0)),              # X row tile
                pl.BlockSpec((None, fin_p, fout_p), lambda m, r: (r, 0, 0)),  # W_neigh[r]
                pl.BlockSpec((fin_p, fout_p), lambda m, r: (0, 0)),          # sum_r W_self
                pl.BlockSpec((1, fout_p), lambda m, r: (0, 0)),              # sum_r bias
            ],
            out_specs=(
                pl.BlockSpec((None, tm, fout_p), lambda m, r: (r, m, 0)),    # HW[r]
                pl.BlockSpec((tm, fout_p), lambda m, r: (m, 0)),             # self + bias
            ),
        ),
        compiler_params=pltpu.CompilerParams(
            dimension_semantics=("parallel", "arbitrary")),
    )(x_b, wn, ws_sum, b_sum)


# ------------------------------ aggregation kernel --------------------------------------
def _sage_agg_kernel(dinv_ref, selfb_ref, a_ref, hw_ref, o_ref, *, apply_relu):
    """grid = (dst_tiles, relations, src_tiles).
    out[m-tile] = selfb[m-tile] + sum_r sum_k (dinv[r] * A[r, m-tile, k-tile]) @ HW[r, k-tile]
    """
    r = pl.program_id(1)
    k = pl.program_id(2)

    @pl.when(jnp.logical_and(r == 0, k == 0))
    def _():
        o_ref[...] = selfb_ref[...]          # hoisted self term + summed bias (f32)

    # int8 0/1 adjacency tile -> f32, scaled by the per-dst-row mean factor, -> bf16 MXU.
    a = (a_ref[...].astype(jnp.float32) * dinv_ref[...]).astype(jnp.bfloat16)
    o_ref[...] += jnp.dot(a, hw_ref[...], preferred_element_type=jnp.float32)

    if apply_relu:
        @pl.when(jnp.logical_and(r == pl.num_programs(1) - 1,
                                 k == pl.num_programs(2) - 1))
        def _():
            o_ref[...] = jnp.maximum(o_ref[...], 0.0)


def sage_aggregate(a_i8, dinv, hw, selfb, *, apply_relu, tm, tk):
    R, n_pad, _ = a_i8.shape
    fout_p = hw.shape[2]
    kernel = functools.partial(_sage_agg_kernel, apply_relu=apply_relu)
    return pl.pallas_call(
        kernel,
        out_shape=jax.ShapeDtypeStruct((n_pad, fout_p), jnp.float32),
        grid_spec=pltpu.PrefetchScalarGridSpec(
            num_scalar_prefetch=0,
            grid=(n_pad // tm, R, n_pad // tk),   # dst tiles (parallel) x rel x src tiles
            in_specs=[
                pl.BlockSpec((None, tm, 1), lambda m, r, k: (r, m, 0)),      # dinv[r] rows
                pl.BlockSpec((tm, fout_p), lambda m, r, k: (m, 0)),          # self + bias
                pl.BlockSpec((None, tm, tk), lambda m, r, k: (r, m, k)),     # int8 A tile
                pl.BlockSpec((None, tk, fout_p), lambda m, r, k: (r, k, 0)),  # HW[r] tile
            ],
            out_specs=pl.BlockSpec((tm, fout_p), lambda m, r, k: (m, 0)),    # f32 accum
        ),
        compiler_params=pltpu.CompilerParams(
            dimension_semantics=("parallel", "arbitrary", "arbitrary")),
    )(dinv, selfb, a_i8, hw)


# ---------------------------------- full forward ----------------------------------------
def gnn_conv_3layers(adj, x, params, *, tm=256, tk=512, compute_dtype=jnp.bfloat16):
    """Forward pass of GNNconv_3layers: conv1 -> relu -> conv2 -> relu -> conv3."""
    assert tm % 128 == 0 and tk % 128 == 0
    R, N, _ = adj.shape
    n_pad = _round_up(N, (tm * tk) // math.gcd(tm, tk))

    adj_f = adj.astype(jnp.float32)
    # DGL 'mean': 1/in_degree per relation (0 contribution for isolated nodes).
    deg = jnp.sum(adj_f, axis=-1, keepdims=True)
    dinv = jnp.where(deg > 0, 1.0 / jnp.maximum(deg, 1.0), 0.0)      # (R, N, 1) f32
    dinv = _pad_axis(dinv, 1, n_pad)
    # 0/1 adjacency streamed as int8 (half the bytes of bf16), shared by all 3 layers.
    a_i8 = _pad_axis(_pad_axis(adj_f.astype(jnp.int8), 1, n_pad), 2, n_pad)

    h = _pad_axis(_pad_axis(x.astype(jnp.float32), 0, n_pad), 1,
                  _round_up(x.shape[1], 128))                       # (n_pad, fin_p) f32

    out = None
    for name, relu in (("layer1", True), ("layer2", True), ("layer3", False)):
        w_self, w_neigh, bias = params[name]
        fin, fout = w_self.shape[1], w_self.shape[2]
        fin_p, fout_p = _round_up(fin, 128), _round_up(fout, 128)
        assert h.shape == (n_pad, fin_p)

        # HeteroGraphConv sums over relations -> self weights / biases are summed once.
        ws_sum = jnp.sum(w_self, axis=0).astype(compute_dtype)
        b_sum = jnp.sum(bias, axis=0).astype(jnp.float32)
        wn = w_neigh.astype(compute_dtype)

        ws_sum = _pad_axis(_pad_axis(ws_sum, 0, fin_p), 1, fout_p)
        b_sum = _pad_axis(b_sum, 1, fout_p)
        wn = _pad_axis(_pad_axis(wn, 1, fin_p), 2, fout_p)

        x_b = h.astype(compute_dtype)
        # Once per layer: HW[r] = X @ W_neigh[r] and the hoisted self/bias term.
        hw, selfb = feature_transform(x_b, wn, ws_sum, b_sum, tm=tm)
        # Dominant work: out = selfb + sum_r (dinv[r] * A[r]) @ HW[r]  (+ ReLU).
        out = sage_aggregate(a_i8, dinv, hw, selfb, apply_relu=relu, tm=tm, tk=tk)
        h = out

    return out[:N, :params["layer3"][0].shape[2]]


# ----------------------------- pure-JAX reference ---------------------------------------
def _ref_model(adj, x, params):
    """Mirrors the kernels' math (summed self weights, bf16 streams, f32 accumulation,
    post-aggregation mean scale) with plain jnp ops on unpadded arrays."""
    adj_f = adj.astype(jnp.float32)
    deg = jnp.sum(adj_f, axis=-1, keepdims=True)
    dinv = jnp.where(deg > 0, 1.0 / jnp.maximum(deg, 1.0), 0.0)
    h = x.astype(jnp.float32)
    R = adj.shape[0]
    out = None
    for name, relu in (("layer1", True), ("layer2", True), ("layer3", False)):
        w_self, w_neigh, bias = params[name]
        ws_sum = jnp.sum(w_self, axis=0).astype(jnp.bfloat16)
        b_sum = jnp.sum(bias, axis=0).astype(jnp.float32)
        hb = h.astype(jnp.bfloat16)
        out = jnp.dot(hb, ws_sum, preferred_element_type=jnp.float32) + b_sum
        for r in range(R):
            hw = jnp.dot(hb, w_neigh[r].astype(jnp.bfloat16),
                         preferred_element_type=jnp.float32).astype(jnp.bfloat16)
            a = (adj_f[r] * dinv[r]).astype(jnp.bfloat16)
            out = out + jnp.dot(a, hw, preferred_element_type=jnp.float32)
        if relu:
            out = jnp.maximum(out, 0.0)
        h = out
    return out


def _init_layer_params(key, num_rel, fin, fout):
    k1, k2, k3 = jax.random.split(key, 3)
    scale = 1.0 / jnp.sqrt(jnp.float32(fin))
    w_self = jax.random.normal(k1, (num_rel, fin, fout), jnp.float32) * scale
    w_neigh = jax.random.normal(k2, (num_rel, fin, fout), jnp.float32) * scale
    bias = jax.random.normal(k3, (num_rel, 1, fout), jnp.float32) * 0.1
    return (w_self, w_neigh, bias)


if __name__ == "__main__":
    # Small synthetic heterograph: single node type, 2 relation types.
    N = 300          # pads to 512 with (tm=128, tk=256) -> 4 dst tiles x 2 src tiles
    IN_FEATS = 8
    HID_FEATS = 32
    OUT_FEATS = 4    # number of classes
    REL_NAMES = ["cites", "links"]
    R = len(REL_NAMES)

    key = jax.random.PRNGKey(0)
    k_adj, k_x, k_l1, k_l2, k_l3 = jax.random.split(key, 5)

    adj = jax.random.bernoulli(k_adj, p=0.1, shape=(R, N, N)).astype(jnp.float32)
    x = jax.random.normal(k_x, (N, IN_FEATS), jnp.float32)

    params = {
        "layer1": _init_layer_params(k_l1, R, IN_FEATS, HID_FEATS),
        "layer2": _init_layer_params(k_l2, R, HID_FEATS, HID_FEATS),
        "layer3": _init_layer_params(k_l3, R, HID_FEATS, OUT_FEATS),
    }

    # Small tiles for the demo (exercises multi-tile dst + src grids); defaults are 256/512.
    out = gnn_conv_3layers(adj, x, params, tm=128, tk=256)
    out = jax.block_until_ready(out)

    ref = _ref_model(adj, x, params)
    assert out.shape == (N, OUT_FEATS), out.shape
    max_err = float(jnp.max(jnp.abs(out - ref)))
    assert jnp.allclose(out, ref, atol=2e-2, rtol=2e-2), f"mismatch vs reference: {max_err}"

    print("KERNEL_OK")
</pallas_src>

<mosaic_0001>
module attributes {stable_mosaic.version = 11 : i64} {
  func.func @_feat_transform_kernel(%arg0: i32, %arg1: i32, %arg2: memref<128x128xbf16, #tpu.memory_space<vmem>>, %arg3: memref<1x128x128xbf16, #tpu.memory_space<vmem>>, %arg4: memref<128x128xbf16, #tpu.memory_space<vmem>>, %arg5: memref<1x128xf32, #tpu.memory_space<vmem>>, %arg6: memref<1x128x128xbf16, #tpu.memory_space<vmem>>, %arg7: memref<128x128xf32, #tpu.memory_space<vmem>>) attributes {dimension_semantics = [#tpu.dimension_semantics<parallel>, #tpu.dimension_semantics<arbitrary>], iteration_bounds = array<i64: 4, 2>, scalar_prefetch = 0 : i64, scratch_operands = 0 : i64, tpu.core_type = #tpu.core_type<tc>, window_params = [{transform_indices = @transform_0, window_bounds = array<i64: 128, 128>}, {transform_indices = @transform_1, window_bounds = array<i64: 1, 128, 128>}, {pipeline_mode = #tpu.pipeline_mode<synchronous>, transform_indices = @transform_2, window_bounds = array<i64: 128, 128>}, {pipeline_mode = #tpu.pipeline_mode<synchronous>, transform_indices = @transform_3, window_bounds = array<i64: 1, 128>}, {transform_indices = @transform_4, window_bounds = array<i64: 1, 128, 128>}, {transform_indices = @transform_5, window_bounds = array<i64: 128, 128>}]} {
    %c0 = arith.constant 0 : index
    %c0_0 = arith.constant 0 : index
    %0 = vector.load %arg2[%c0, %c0_0] : memref<128x128xbf16, #tpu.memory_space<vmem>>, vector<128x128xbf16>
    %c0_1 = arith.constant 0 : index
    %c0_2 = arith.constant 0 : index
    %c0_3 = arith.constant 0 : index
    %1 = vector.load %arg3[%c0_1, %c0_2, %c0_3] : memref<1x128x128xbf16, #tpu.memory_space<vmem>>, vector<1x128x128xbf16>
    %2 = vector.shape_cast %1 : vector<1x128x128xbf16> to vector<128x128xbf16>
    %cst = arith.constant dense<0.000000e+00> : vector<128x128xf32>
    %3 = tpu.matmul %0, %2, %cst {dimension_numbers = #tpu.dot_dimension_numbers<[1], [0], [0], [1], [0, 0, 1, 1], [], []>} : vector<128x128xbf16>, vector<128x128xbf16>, vector<128x128xf32> -> vector<128x128xf32>
    %4 = arith.truncf %3 : vector<128x128xf32> to vector<128x128xbf16>
    %c0_4 = arith.constant 0 : index
    %c0_5 = arith.constant 0 : index
    %c0_6 = arith.constant 0 : index
    %5 = vector.load %arg6[%c0_4, %c0_5, %c0_6] : memref<1x128x128xbf16, #tpu.memory_space<vmem>>, vector<1x128x128xbf16>
    %6 = vector.shape_cast %5 : vector<1x128x128xbf16> to vector<128x128xbf16>
    %7 = vector.shape_cast %4 : vector<128x128xbf16> to vector<1x128x128xbf16>
    tpu.vector_store %arg6[%c0_4, %c0_5, %c0_6], %7 {strides = array<i32>} : memref<1x128x128xbf16, #tpu.memory_space<vmem>>, vector<1x128x128xbf16>,
    %c0_i32 = arith.constant 0 : i32
    %8 = arith.cmpi eq, %arg1, %c0_i32 : i32
    %9 = arith.extui %8 : i1 to i32
    %c0_i32_7 = arith.constant 0 : i32
    %10 = arith.cmpi ne, %9, %c0_i32_7 : i32
    scf.if %10 {
      %c0_8 = arith.constant 0 : index
      %c0_9 = arith.constant 0 : index
      %11 = vector.load %arg4[%c0_8, %c0_9] : memref<128x128xbf16, #tpu.memory_space<vmem>>, vector<128x128xbf16>
      %cst_10 = arith.constant dense<0.000000e+00> : vector<128x128xf32>
      %12 = tpu.matmul %0, %11, %cst_10 {dimension_numbers = #tpu.dot_dimension_numbers<[1], [0], [0], [1], [0, 0, 1, 1], [], []>} : vector<128x128xbf16>, vector<128x128xbf16>, vector<128x128xf32> -> vector<128x128xf32>
      %c0_11 = arith.constant 0 : index
      %c0_12 = arith.constant 0 : index
      %13 = vector.load %arg5[%c0_11, %c0_12] : memref<1x128xf32, #tpu.memory_space<vmem>>, vector<1x128xf32>
      %14 = vector.broadcast %13 : vector<1x128xf32> to vector<128x128xf32>
      %15 = arith.addf %12, %14 : vector<128x128xf32>
      %c0_13 = arith.constant 0 : index
      %c0_14 = arith.constant 0 : index
      %16 = vector.load %arg7[%c0_13, %c0_14] : memref<128x128xf32, #tpu.memory_space<vmem>>, vector<128x128xf32>
      tpu.vector_store %arg7[%c0_13, %c0_14], %15 {strides = array<i32>} : memref<128x128xf32, #tpu.memory_space<vmem>>, vector<128x128xf32>,
    } else {
    }
    return
  }
  func.func @transform_0(%arg0: i32, %arg1: i32) -> (i32, i32) {
    %c0_i32 = arith.constant 0 : i32
    %c0_i32_0 = arith.constant 0 : i32
    return %arg0, %c0_i32 : i32, i32
  }
  func.func @transform_1(%arg0: i32, %arg1: i32) -> (i32, i32, i32) {
    %c0_i32 = arith.constant 0 : i32
    %c0_i32_0 = arith.constant 0 : i32
    %c0_i32_1 = arith.constant 0 : i32
    return %arg1, %c0_i32, %c0_i32_0 : i32, i32, i32
  }
  func.func @transform_2(%arg0: i32, %arg1: i32) -> (i32, i32) {
    %c0_i32 = arith.constant 0 : i32
    %c0_i32_0 = arith.constant 0 : i32
    %c0_i32_1 = arith.constant 0 : i32
    return %c0_i32, %c0_i32_0 : i32, i32
  }
  func.func @transform_3(%arg0: i32, %arg1: i32) -> (i32, i32) {
    %c0_i32 = arith.constant 0 : i32
    %c0_i32_0 = arith.constant 0 : i32
    %c0_i32_1 = arith.constant 0 : i32
    return %c0_i32, %c0_i32_0 : i32, i32
  }
  func.func @transform_4(%arg0: i32, %arg1: i32) -> (i32, i32, i32) {
    %c0_i32 = arith.constant 0 : i32
    %c0_i32_0 = arith.constant 0 : i32
    return %arg1, %arg0, %c0_i32 : i32, i32, i32
  }
  func.func @transform_5(%arg0: i32, %arg1: i32) -> (i32, i32) {
    %c0_i32 = arith.constant 0 : i32
    %c0_i32_0 = arith.constant 0 : i32
    return %arg0, %c0_i32 : i32, i32
  }
}

</mosaic_0001>

<bundles_post_ra>
// kernel: tpu_custom_call.1
= control target key start
LH: loop header
LB: loop body
LE: loop exit
PB: predicated region body
PF: predicated region fallthrough
CT: control target
= control target key end

     0   :  { %s2199_s0 = inlined_call_operand.hbm [shape: bf16[512,128], index: 0, kind: input, shape index: {}]   ;;  %s2200_s1 = inlined_call_operand.hbm [shape: bf16[2,128,128], index: 1, kind: input, shape index: {}]   ;;  %s2201_s2 = inlined_call_operand.hbm [shape: bf16[128,128], index: 2, kind: input, shape index: {}]   ;;  %s2202_s3 = inlined_call_operand.vmem [shape: f32[1,128], index: 3, kind: input, shape index: {}]   ;;  %s2203_s4 = inlined_call_operand.hbm [shape: bf16[2,512,128], index: 4, kind: output, shape index: {0}]   ;;  %s2204_s5 = inlined_call_operand.hbm [shape: f32[512,128], index: 5, kind: output, shape index: {1}]  }
   0x1   :  { %2234 = sst [smem:[#allocation30_spill]] %s2199_s0 }
   0x2   :  { %2235 = sst [smem:[#allocation31_spill]] %s2200_s1 }
   0x3   :  { %2236 = sst [smem:[#allocation32_spill]] %s2201_s2 }
   0x4   :  { %2237 = sst [smem:[#allocation33_spill]] %s2202_s3 }
   0x5   :  { %2238 = sst [smem:[#allocation34_spill]] %s2203_s4 }
   0x6   :  { %2239 = sst [smem:[#allocation35_spill]] %s2204_s5 }
   0x7   :  { %11 = vsyncpa [#allocation3], 0 }
   0x8   :  { %13 = vsyncpa [#allocation3 + $0x1], 0 }
   0x9   :  { %14 = vsyncpa [#allocation6], 0 }
   0xa   :  { %16 = vsyncpa [#allocation6 + $0x1], 0 }
   0xb   :  { %17 = vsyncpa [#allocation4], 0 }
   0xc   :  { %19 = vsyncpa [#allocation4 + $0x1], 0 }
   0xd   :  { %20 = vsyncpa [#allocation10], 0 }
   0xe   :  { %22 = vsyncpa [#allocation10 + $0x1], 0  ;;  %s1753_s18 = smov 0   ;;  %s1755_s19 = smov 0  }
   0xf   :  { %s1757_s20 = smov 0   ;;  %s1759_s21 = smov 0  }
  0x10   :  { %s1761_s22 = smov 0   ;;  %s1763_s23 = smov 0  }
  0x11   :  { %s1765_s24 = smov 0   ;;  %s1767_s25 = smov 0  }
  0x12   :  { %s1769_s26 = smov 0   ;;  %s1771_s27 = smov 0  }
  0x13   :  { %s1773_s28 = smov 0   ;;  %s1775_s29 = smov 0  }
  0x14   :  { %s1777_s30 = smov 0   ;;  %s1779_s6 = smov 0  }
  0x15 LB: > { %2240 = sst [smem:[#allocation16_spill]] %s1658_s18  ;;  %s1822_s7 = sadd.s32 4294967295, %s1710_s6   ;;  %s1710_s6 = sphi %s1779_s6, %s28_s6   ;;  %s1706_s30 = sphi %s1777_s30, %s2311_s30   ;;  %s1702_s29 = sphi %s1775_s29, %s2310_s29   ;;  %s1698_s28 = sphi %s1773_s28, %s2309_s28   ;;  %s1694_s27 = sphi %s1771_s27, %s2308_s27   ;;  %s1690_s26 = sphi %s1769_s26, %s2307_s26   ;;  %s1686_s25 = sphi %s1767_s25, %s2306_s25   ;;  %s1682_s24 = sphi %s1765_s24, %s2305_s24   ;;  %s1678_s23 = sphi %s1763_s23, %s2304_s23   ;;  %s1674_s22 = sphi %s1761_s22, %s2303_s22   ;;  %s1670_s21 = sphi %s1759_s21, %s2298_s21   ;;  %s1666_s20 = sphi %s1757_s20, %s2302_s20   ;;  %s1662_s19 = sphi %s1755_s19, %s2301_s19   ;;  %s1658_s18 = sphi %s1753_s18, %s2297_s18  }
  0x16   : > { %2241 = sst [smem:[#allocation17_spill]] %s1662_s19  ;;  %s1008_s8 = sadd.s32 4294967294, %s1710_s6  }
  0x17   : > { %2242 = sst [smem:[#allocation18_spill]] %s1674_s22  ;;  %p60_p0 = scmp.ne.s32.totalorder %s1686_s25, %s1682_s24 }
  0x18   : > { %2243 = sst [smem:[#allocation19_spill]] %s1682_s24  ;;  %p2221_p1 = scmp.eq.s32.totalorder %s1822_s7, 0 }
  0x19   : > { %2244 = sst [smem:[#allocation20_spill]] %s1694_s27  ;;  %p86_p2 = scmp.ne.s32.totalorder %s1674_s22, %s1670_s21 }
  0x1a   : > { %2245 = sst [smem:[#allocation21_spill]] %s1698_s28  ;;  %p153_p3 = scmp.ne.s32.totalorder %s1666_s20, %s1662_s19 }
  0x1b   : > { %2246 = sst [smem:[#allocation22_spill]] %s1822_s7  ;;  %p1836_p4 = por %p2221_p1, %p60_p0 }
  0x1c   : > { %p2205_p5 = scmp.eq.s32.totalorder %s1822_s7, 7  ;;  %p1843_p6 = por %p86_p2, %p2221_p1 }
  0x1d   : > { %s2247_s9 = scalar_select %p1836_p4, 1, 0 }
  0x1e   : > { %s2249_s10 = scalar_select %p1843_p6, 1, 0 }
  0x1f   : > { %2248 = sst [smem:[#allocation23_spill]] %s2247_s9  ;;  %p159_p7 = scmp.ne.s32.totalorder %s1662_s19, %s1658_s18 }
  0x20   : > { %2250 = sst [smem:[#allocation24_spill]] %s2249_s10  ;;  %p1851_p8 = por %p2205_p5, %p153_p3 }
  0x21   : > { %p160_p9 = scmp.eq.s32.totalorder %s1008_s8, 7  ;;  %p1009_p10 = scmp.ge.s32.totalorder %s1710_s6, 1 }
  0x22   : > { %s2251_s11 = scalar_select %p1851_p8, 1, 0 }
  0x23   : > { %p193_p11 = scmp.lt.s32.totalorder %s1710_s6, 9  ;;  %p1857_p12 = por %p160_p9, %p159_p7 }
  0x24   : > { %2252 = sst [smem:[#allocation25_spill]] %s2251_s11  ;;  %p1864_p13 = por %p160_p9, %p60_p0 }
  0x25   : > { %s2253_s12 = scalar_select %p1857_p12, 1, 0 }
  0x26   : > { %s2255_s13 = scalar_select %p1864_p13, 1, 0 }
  0x27   : > { %2254 = sst [smem:[#allocation26_spill]] %s2253_s12  ;;  %p1868_p2 = pnand %p1009_p10, %p193_p11 }
  0x28   : > { %2256 = sst [smem:[#allocation27_spill]] %s2255_s13  ;;  %s1712_s15 = smov [#allocation7]  }
  0x29   : > { %p1281_p3 = pneg %p1868_p2  ;;  %s205_s16 = sshll.u32 %s1712_s15, 4  ;;  %s206_s16 = int_to_ptr.vmem [resolvable:$true] %s205_s16 }
  0x2a   : > { %s1457_s17 = scalar_lea.vmem %s206_s16, 1024  ;;  %p1465_p9 = scmp.lt.s32.totalorder %s206_s16, %s206_s16 }
  0x2b   : > { %p1282_p7 = pnand %p1281_p3, %p2221_p1  ;;  %p1458_p12 = scmp.ne.s32.totalorder %s206_s16, %s1457_s17 }
  0x2c   : > { %p1466_p6 = scmp.lt.s32.totalorder %s1457_s17, %s1457_s17 }
  0x2d   : > { %p1448_p5 = pneg %p1282_p7 }
  0x2e   : > { %p1467_p13 = por %p1466_p6, %p1465_p9 }
  0x2f   : > { %p1460_p8 = pnand %p1458_p12, %p1448_p5 }
  0x31   : > { %p1461_p0 = pneg %p1460_p8 }
  0x33   : > { %p1468_p10 = pnand %p1467_p13, %p1461_p0 }
  0x35   : > { %1471 = shalt.err (!%p1468_p10)
}
  0x36   : > { %s2217_s21 = smov 64   ;;  %s2219_s8 = smov 4  }
  0x37   : > { %s2258_s2 = sld [smem:[#allocation32_spill]]  ;;  %p54_p5 = scmp.ne.s32.totalorder %s1690_s26, %s1686_s25 }
  0x38   : > { %p55_p6 = scmp.eq.s32.totalorder %s1710_s6, 0  ;;  %p1300_p8 = scmp.lt.s32.totalorder %s1710_s6, 8 }
  0x39   : > { %p2259_p11 = scmp.eq.s32.totalorder %s1822_s7, 7  ;;  %s222_s12 = sand.u32 1, %s1690_s26  }
  0x3a   : > { %p56_p13 = por %p55_p6, %p54_p5  ;;  %s1012_s18 = sshll.u32 %s222_s12, 6 }
  0x3b   : > { %p1889_p12 = por %p2259_p11, %p54_p5  ;;  %s1075_s5 = sshll.u32 %s1706_s30, 10 }
  0x3c   : > { %s2262_s0 = sld [smem:[#allocation30_spill]]  ;;  %s226_s15 = scalar_lea.vmem [#allocation2], %s1012_s18 }
  0x3d   : > { %1284 = dma.hbm_to_vmem [thread:$0]  (!%p1282_p7), %s2258_s2, 1024, %s206_s16, [#allocation6], %s2217_s21, %s2217_s21, %s2219_s8  }
  0x3e   : > { %s2260_s24 = scalar_select %p1889_p12, 1, 0 }
  0x3f   : > { %s233_s16 = sshll.u32 %s226_s15, 4  ;;  %p1902_p3 = pnand %p1300_p8, %p56_p13  ;;  %s234_s16 = int_to_ptr.vmem [resolvable:$true] %s233_s16 }
  0x40   : > { %2261 = sst [smem:[#allocation28_spill]] %s2260_s24  ;;  %s223_s13 = scalar_lea.sflag [#allocation3], %s222_s12 }
  0x41   : > { %p1474_p7 = pneg %p1902_p3  ;;  %s1485_s21 = scalar_lea.vmem %s234_s16, 1024 }
  0x42   : > { %s232_s28 = scalar_lea.hbm %s2262_s0, %s1075_s5  ;;  %p1486_p0 = scmp.ne.s32.totalorder %s234_s16, %s1485_s21 }
  0x43   : > { %s1715_s8 = smov [#allocation2]  }
  0x44   : > { %p1488_p9 = pnand %p1486_p0, %p1474_p7  ;;  %s1490_s2 = sshll.u32 %s1715_s8, 4  ;;  %s1491_s2 = int_to_ptr.vmem [resolvable:$false] %s1490_s2 }
  0x45   : > { %s1492_s4 = scalar_lea.vmem %s1491_s2, 2048  ;;  %p1493_p5 = scmp.lt.s32.totalorder %s234_s16, %s1491_s2 }
  0x46   : > { %p1489_p10 = pneg %p1488_p9  ;;  %p1494_p11 = scmp.lt.s32.totalorder %s1492_s4, %s1485_s21 }
  0x48   : > { %p1495_p1 = por %p1494_p11, %p1493_p5 }
  0x4a   : > { %p1496_p13 = pnand %p1495_p1, %p1489_p10 }
  0x4c   : > { %1499 = shalt.err (!%p1496_p13)
}
  0x4d   : > { %s2264_s5 = smov 4   ;;  %s2265_s18 = smov 64  }
  0x4e   : > { %1288 = dma.hbm_to_vmem [thread:$0]  (!%p1902_p3), %s232_s28, 1024, %s234_s16, %s223_s13, %s2265_s18, %s2265_s18, %s2264_s5  }
  0x4f   : > { %s47_s2 = sadd.s32 1, %s1690_s26  ;;  %s37_s11 = sadd.s32 1, %s1702_s29 }
  0x50   : > { %p38_p1 = scmp.ge.s32.totalorder %s37_s11, 2  ;;  %s73_s12 = sadd.s32 1, %s1678_s23 }
  0x51   : > { %p80_p7 = scmp.ne.s32.totalorder %s1678_s23, %s1674_s22  ;;  %s143_s21 = sadd.s32 1, %s1666_s20 }
  0x52   : > { %s2313_s11 = smov (%p38_p1, %s37_s11), 0  ;;  %s2267_s8 = sadd.s32 1, %s1706_s30 }
  0x53   : > { %2266 = sst [smem:[#allocation29_spill]] %s2313_s11  ;;  %s2315_s8 = smov (!%p38_p1, %s2267_s8), %s1706_s30 }
  0x54   : > { %s70_s15 = ssub.s32 %s1702_s29, %s2313_s11  ;;  %s243_s17 = sand.u32 1, %s1710_s6  }
  0x55   : > { %p42_p0 = scmp.ge.s32.totalorder %s2315_s8, 4  ;;  %p71_p3 = scmp.eq.s32.totalorder %s70_s15, 0 }
  0x56   : > { %p1929_p9 = por %p80_p7, %p55_p6  ;;  %s245_s13 = sand.u32 1, %s1678_s23  }
  0x57   : > { %s2317_s8 = smov (%p42_p0, %s2315_s8), 0  ;;  %s1015_s0 = sshll.u32 %s245_s13, 6 }
  0x58   : > { %s1937_s16 = scalar_select %p71_p3, %s1678_s23, %s73_s12  }
  0x59   : > { %s44_s4 = ssub.s32 %s1706_s30, %s2317_s8  ;;  %s1076_s27 = sshll.u32 %s1702_s29, 10 }
  0x5a   : > { %p45_p10 = scmp.eq.s32.totalorder %s44_s4, 0  ;;  %s140_s11 = sor.u32 %s70_s15, %s44_s4 }
  0x5b   : > { %p141_p5 = scmp.eq.s32.totalorder %s140_s11, 0  ;;  %s247_s19 = scalar_lea.vmem [#allocation5], %s1015_s0 }
  0x5c   : > { %s1942_s24 = scalar_select %p45_p10, %s1690_s26, %s47_s2  }
  0x5d   : > { %s1945_s3 = scalar_select %p141_p5, %s1666_s20, %s143_s21  }
  0x5e   : > { %s254_s10 = sshll.u32 %s247_s19, 4  ;;  %s2269_s1 = sld [smem:[#allocation31_spill]]  ;;  %s255_s10 = int_to_ptr.vmem [resolvable:$true] %s254_s10 }
  0x5f   : > { %p1955_p6 = pnand %p1300_p8, %p1929_p9  ;;  %s244_s11 = scalar_lea.sflag [#allocation6], %s243_s17 }
  0x60   : > { %s1513_s2 = scalar_lea.vmem %s255_s10, 1024  ;;  %s1716_s0 = smov [#allocation5]  }
  0x61   : > { %p1502_p11 = pneg %p1955_p6  ;;  %p1514_p13 = scmp.ne.s32.totalorder %s255_s10, %s1513_s2 }
  0x62   : > { %s1518_s19 = sshll.u32 %s1716_s0, 4  ;;  %s1519_s19 = int_to_ptr.vmem [resolvable:$false] %s1518_s19 }
  0x63   : > { %p1516_p1 = pnand %p1514_p13, %p1502_p11  ;;  %s1520_s22 = scalar_lea.vmem %s1519_s19, 2048 }
  0x64   : > { %s253_s9 = scalar_lea.hbm %s2269_s1, %s1076_s27  ;;  %p1521_p0 = scmp.lt.s32.totalorder %s255_s10, %s1519_s19 }
  0x65   : > { %p1517_p7 = pneg %p1516_p1  ;;  %p1522_p3 = scmp.lt.s32.totalorder %s1520_s22, %s1513_s2 }
  0x67   : > { %p1523_p10 = por %p1522_p3, %p1521_p0 }
  0x69   : > { %p1524_p5 = pnand %p1523_p10, %p1517_p7 }
  0x6b   : > { %1527 = shalt.err (!%p1524_p5)
}
  0x6c   : > { %1291 = dma.hbm_to_vmem [thread:$0]  (!%p1955_p6), %s253_s9, 1024, %s255_s10, %s244_s11, %s2265_s18, %s2265_s18, %s2264_s5  }
  0x6d   : > { %266 = sbr.rel (%p1868_p2) target bundleno = 670 (0x29e), region = 36  ;;  %s1969_s7 = sand.u32 (!%p1868_p2), 1, %s1686_s25  }
  0x6e   : > { %s1019_s21 = sshll.u32 (!%p1868_p2), %s1969_s7, 6  ;;  %s269_s15 = scalar_lea.sflag (!%p1868_p2), [#allocation3], %s1969_s7 }
  0x6f   : > { %s1973_s17 = scalar_lea.vmem (!%p1868_p2), [#allocation2], %s1019_s21 }
  0x72   : > { %1637 = dma.done.wait (%p1836_p4), %s269_s15, 1024  }
  0x73   : > { %1639 = vsyncadd (%p1836_p4), %s269_s15, 4294966272  ;;  %s2272_s28 = sld [smem:[#allocation22_spill]] }
  0x74   : > { %s2273_s9 = sld [smem:[#allocation18_spill]] }
  0x75   : > { %s2274_s10 = sld [smem:[#allocation24_spill]] }
  0x79   : > { %s277_s14 = sand.u32 1, %s2272_s28  }
  0x7a   : > { %s279_s5 = sand.u32 1, %s2273_s9   ;;  %s278_s13 = scalar_lea.sflag [#allocation6], %s277_s14 }
  0x7b   : > { %s1020_s18 = sshll.u32 %s279_s5, 6  ;;  %p2275_p2 = scmp.ne.s32.totalorder %s2274_s10, 0 }
  0x7c   : > { %s1981_s4 = scalar_lea.vmem [#allocation5], %s1020_s18 }
  0x7d   : > { %1641 = dma.done.wait (%p2275_p2), %s278_s13, 1024  }
  0x7e   : > { %1643 = vsyncadd (%p2275_p2), %s278_s13, 4294966272  ;;  %p2276_p8 = scmp.eq.s32.totalorder %s2272_s28, 0 }
  0x80   : > { %1645 = dma.done.wait (%p2276_p8), [#allocation6], 1024   ;;  %p2277_p9 = pmov %p2276_p8 }
  0x81   : > { %s1023_s12 = sshll.u32 %s1969_s7, 7  ;;  %v1422_v0 = vld [vmem:[%s1981_s4 + $0x38] sm:$0xff]   ;;  %v1423_v1 = vld [vmem:[%s1981_s4 + $0x30] sm:$0xff]   ;;  %v1424_v2 = vld [vmem:[%s1981_s4 + $0x28] sm:$0xff]   ;;  %s2278_s11 = sld [smem:[#allocation17_spill]] }
  0x82   : > { %1647 = vsyncadd (%p2277_p9), [#allocation6], 4294966272  ;;  %1173 = vmatprep.subr.bf16.mxu0 %v1422_v0  ;;  %1237 = vmatprep.subr.bf16.mxu1 %v1422_v0  ;;  %v1425_v3 = vld [vmem:[%s1981_s4 + $0x20] sm:$0xff]   ;;  %v1426_v6 = vld [vmem:[%s1981_s4 + $0x18] sm:$0xff]   ;;  %s2047_s22 = scalar_lea.vmem [#allocation9], %s1023_s12  ;;  %s2279_s27 = sld [smem:[#allocation20_spill]] }
  0x83   : > { %1174 = vmatpush3.bf16.msra.mxu0 %v1422_v0  ;;  %1245 = vmatpush3.bf16.msra.mxu1 %v1422_v0  ;;  %v1997_v4 = vld [vmem:[%s1973_s17] sm:$0xff]   ;;  %v1427_v7 = vld [vmem:[%s1981_s4 + $0x10] sm:$0xff]   ;;  %v1428_v8 = vld [vmem:[%s1981_s4 + $0x8] sm:$0xff]  }
  0x84   : > { %1175 = vmatprep.subr.bf16.mxu0 %v1423_v1  ;;  %1238 = vmatprep.subr.bf16.mxu1 %v1423_v1  ;;  %v2000_v5 = vld [vmem:[%s1973_s17 + $0x20] sm:$0xff]   ;;  %v2009_v10 = vld [vmem:[%s1973_s17 + $0x8] sm:$0xff]   ;;  %v2015_v12 = vld [vmem:[%s1973_s17 + $0x10] sm:$0xff]  }
  0x85   : > { %1189 = vmatprep.mubr.bf16.mxu0 %v1997_v4  ;;  %1197 = vmatprep.mubr.bf16.mxu1 %v2000_v5  ;;  %v1429_v9 = vld [vmem:[%s1981_s4] sm:$0xff]   ;;  %v2012_v11 = vld [vmem:[%s1973_s17 + $0x28] sm:$0xff]   ;;  %v2018_v13 = vld [vmem:[%s1973_s17 + $0x30] sm:$0xff]  }
  0x86   : > { %v2025_v14 = vld [vmem:[%s1973_s17 + $0x18] sm:$0xff]  }
  0x87   : > { %1176 = vmatpush3.bf16.msra.mxu0 %v1423_v1  ;;  %1246 = vmatpush3.bf16.msra.mxu1 %v1423_v1  ;;  %v2028_v15 = vld [vmem:[%s1973_s17 + $0x38] sm:$0xff]   ;;  %s312_s2 = sand.u32 1, %s2278_s11  }
  0x88   : > { %1177 = vmatprep.subr.bf16.mxu0 %v1424_v2  ;;  %1239 = vmatprep.subr.bf16.mxu1 %v1424_v2  ;;  %s1022_s0 = sshll.u32 %s312_s2, 6  ;;  %p1056_p4 = scmp.ne.s32.totalorder %s2279_s27, 0 }
  0x89   : > { %s2035_s19 = scalar_lea.vmem [#allocation8], %s1022_s0  ;;  %s2280_s17 = sld [smem:[#allocation33_spill]] (!%p1056_p4) }
  0x8b   : > { %1178 = vmatpush3.bf16.msra.mxu0 %v1424_v2  ;;  %1247 = vmatpush3.bf16.msra.mxu1 %v1424_v2 }
  0x8c   : > { %1179 = vmatprep.subr.bf16.mxu0 %v1425_v3  ;;  %1240 = vmatprep.subr.bf16.mxu1 %v1425_v3 }
  0x8f   : > { %1180 = vmatpush3.bf16.msra.mxu0 %v1425_v3  ;;  %1248 = vmatpush3.bf16.msra.mxu1 %v1425_v3 }
  0x90   : > { %1181 = vmatprep.subr.bf16.mxu0 %v1426_v6  ;;  %1241 = vmatprep.subr.bf16.mxu1 %v1426_v6 }
  0x93   : > { %1182 = vmatpush3.bf16.msra.mxu0 %v1426_v6  ;;  %1249 = vmatpush3.bf16.msra.mxu1 %v1426_v6 }
  0x94   : > { %1183 = vmatprep.subr.bf16.mxu0 %v1427_v7  ;;  %1242 = vmatprep.subr.bf16.mxu1 %v1427_v7 }
  0x97   : > { %1184 = vmatpush3.bf16.msra.mxu0 %v1427_v7  ;;  %1250 = vmatpush3.bf16.msra.mxu1 %v1427_v7 }
  0x98   : > { %1185 = vmatprep.subr.bf16.mxu0 %v1428_v8  ;;  %1243 = vmatprep.subr.bf16.mxu1 %v1428_v8 }
  0x9b   : > { %1186 = vmatpush3.bf16.msra.mxu0 %v1428_v8  ;;  %1251 = vmatpush3.bf16.msra.mxu1 %v1428_v8 }
  0x9c   : > { %1187 = vmatprep.subr.bf16.mxu0 %v1429_v9  ;;  %1244 = vmatprep.subr.bf16.mxu1 %v1429_v9 }
  0x9f   : > { %1188 = vmatpush3.bf16.msra.mxu0 %v1429_v9  ;;  %1252 = vmatpush3.bf16.msra.mxu1 %v1429_v9 }
  0xa2   : > { %1190 = vmatmul.mubr.bf16.vlgmr.msra.gmra.mxu0 %v2009_v10  ;;  %1198 = vmatmul.mubr.bf16.vlgmr.msra.gmra.mxu1 %v2012_v11 }
  0xa3   : > { %1193 = vmatprep.mubr.bf16.mxu0 %v2015_v12  ;;  %1201 = vmatprep.mubr.bf16.mxu1 %v2018_v13 }
  0xaa   : > { %1194 = vmatmul.mubr.bf16.gmra.mxu0 %v2025_v14  ;;  %1202 = vmatmul.mubr.bf16.gmra.mxu1 %v2028_v15 }
 0x162   : > { %v1191_v16 = vpop.f32.mrf.mxu0  ;;  %v1199_v17 = vpop.f32.mrf.mxu1 }
 0x164   : > { %v488_v18 = vpop.f32.mrf.mxu0  ;;  %v520_v19 = vpop.f32.mrf.mxu1 }
 0x166   : > { %v1192_v20 = vpop.f32.mrf.mxu0  ;;  %v1200_v21 = vpop.f32.mrf.mxu1 }
 0x167   : > { %v1102_v22 = vpack.c.bf16 %v1192_v20, %v1191_v16  ;;  %v1122_v23 = vpack.c.bf16 %v1200_v21, %v1199_v17 }
 0x168   : > { %v491_v24 = vpop.f32.mrf.mxu0  ;;  %v523_v25 = vpop.f32.mrf.mxu1 }
 0x169   : > { %1134 = vst [vmem:[%s2035_s19 + $0x8] sm:$0xff] %v1102_v22   ;;  %1138 = vst [vmem:[%s2035_s19 + $0x28] sm:$0xff] %v1122_v23   ;;  %v1097_v26 = vpack.c.bf16 %v491_v24, %v488_v18  ;;  %v1117_v27 = vpack.c.bf16 %v523_v25, %v520_v19 }
 0x16a   : > { %v1195_v28 = vpop.f32.mrf.mxu0  ;;  %v1203_v29 = vpop.f32.mrf.mxu1 }
 0x16b   : > { %1098 = vst [vmem:[%s2035_s19] sm:$0xff] %v1097_v26   ;;  %1137 = vst [vmem:[%s2035_s19 + $0x20] sm:$0xff] %v1117_v27  }
 0x16c   : > { %v504_v30 = vpop.f32.mrf.mxu0  ;;  %v536_v31 = vpop.f32.mrf.mxu1 }
 0x16e   : > { %v1196_v32 = vpop.f32.mrf.mxu0  ;;  %v1204_v33 = vpop.f32.mrf.mxu1 }
 0x16f   : > { %v1112_v34 = vpack.c.bf16 %v1196_v32, %v1195_v28  ;;  %v1132_v35 = vpack.c.bf16 %v1204_v33, %v1203_v29  ;;  %634 = sbr.rel (%p1056_p4) target bundleno = 615 (0x267), region = 52 }
 0x170   : > { %v507_v36 = vpop.f32.mrf.mxu0  ;;  %v539_v37 = vpop.f32.mrf.mxu1 }
 0x171   : > { %1136 = vst [vmem:[%s2035_s19 + $0x18] sm:$0xff] %v1112_v34   ;;  %1140 = vst [vmem:[%s2035_s19 + $0x38] sm:$0xff] %v1132_v35   ;;  %v1107_v38 = vpack.c.bf16 %v507_v36, %v504_v30  ;;  %v1127_v39 = vpack.c.bf16 %v539_v37, %v536_v31 }
 0x173   : > { %1135 = vst [vmem:[%s2035_s19 + $0x10] sm:$0xff] %v1107_v38   ;;  %1139 = vst [vmem:[%s2035_s19 + $0x30] sm:$0xff] %v1127_v39  }
 0x174   : > { %v1438_v40 = vld [vmem:[#allocation7 + $0x38] sm:$0xff]   ;;  %1221 = vmatprep.mubr.bf16.mxu0 %v1997_v4  ;;  %1229 = vmatprep.mubr.bf16.mxu1 %v2000_v5  ;;  %v1439_v41 = vld [vmem:[#allocation7 + $0x30] sm:$0xff]   ;;  %v1440_v42 = vld [vmem:[#allocation7 + $0x28] sm:$0xff]  }
 0x175   : > { %1205 = vmatprep.subr.bf16.mxu0 %v1438_v40  ;;  %1253 = vmatprep.subr.bf16.mxu1 %v1438_v40  ;;  %v1441_v43 = vld [vmem:[#allocation7 + $0x20] sm:$0xff]   ;;  %v1442_v44 = vld [vmem:[#allocation7 + $0x18] sm:$0xff]   ;;  %v1443_v45 = vld [vmem:[#allocation7 + $0x10] sm:$0xff]  }
 0x176   : > { %1206 = vmatpush3.bf16.msra.mxu0 %v1438_v40  ;;  %1261 = vmatpush3.bf16.msra.mxu1 %v1438_v40  ;;  %v1444_v46 = vld [vmem:[#allocation7 + $0x8] sm:$0xff]   ;;  %v1445_v47 = vld [vmem:[#allocation7] sm:$0xff]  }
 0x177   : > { %1207 = vmatprep.subr.bf16.mxu0 %v1439_v41  ;;  %1254 = vmatprep.subr.bf16.mxu1 %v1439_v41  ;;  %v1057_v48 = vld [vmem:[%s2280_s17] ss:$0 sm:$0xff] }
 0x17a   : > { %1208 = vmatpush3.bf16.msra.mxu0 %v1439_v41  ;;  %1262 = vmatpush3.bf16.msra.mxu1 %v1439_v41 }
 0x17b   : > { %1209 = vmatprep.subr.bf16.mxu0 %v1440_v42  ;;  %1255 = vmatprep.subr.bf16.mxu1 %v1440_v42 }
 0x17e   : > { %1210 = vmatpush3.bf16.msra.mxu0 %v1440_v42  ;;  %1263 = vmatpush3.bf16.msra.mxu1 %v1440_v42 }
 0x17f   : > { %1211 = vmatprep.subr.bf16.mxu0 %v1441_v43  ;;  %1256 = vmatprep.subr.bf16.mxu1 %v1441_v43 }
 0x182   : > { %1212 = vmatpush3.bf16.msra.mxu0 %v1441_v43  ;;  %1264 = vmatpush3.bf16.msra.mxu1 %v1441_v43 }
 0x183   : > { %1213 = vmatprep.subr.bf16.mxu0 %v1442_v44  ;;  %1257 = vmatprep.subr.bf16.mxu1 %v1442_v44 }
 0x186   : > { %1214 = vmatpush3.bf16.msra.mxu0 %v1442_v44  ;;  %1265 = vmatpush3.bf16.msra.mxu1 %v1442_v44 }
 0x187   : > { %1215 = vmatprep.subr.bf16.mxu0 %v1443_v45  ;;  %1258 = vmatprep.subr.bf16.mxu1 %v1443_v45 }
 0x18a   : > { %1216 = vmatpush3.bf16.msra.mxu0 %v1443_v45  ;;  %1266 = vmatpush3.bf16.msra.mxu1 %v1443_v45 }
 0x18b   : > { %1217 = vmatprep.subr.bf16.mxu0 %v1444_v46  ;;  %1259 = vmatprep.subr.bf16.mxu1 %v1444_v46 }
 0x18e   : > { %1218 = vmatpush3.bf16.msra.mxu0 %v1444_v46  ;;  %1267 = vmatpush3.bf16.msra.mxu1 %v1444_v46 }
 0x18f   : > { %1219 = vmatprep.subr.bf16.mxu0 %v1445_v47  ;;  %1260 = vmatprep.subr.bf16.mxu1 %v1445_v47 }
 0x192   : > { %1220 = vmatpush3.bf16.msra.mxu0 %v1445_v47  ;;  %1268 = vmatpush3.bf16.msra.mxu1 %v1445_v47 }
 0x195   : > { %1222 = vmatmul.mubr.bf16.vlgmr.msra.gmra.mxu0 %v2009_v10  ;;  %1230 = vmatmul.mubr.bf16.vlgmr.msra.gmra.mxu1 %v2012_v11 }
 0x196   : > { %1225 = vmatprep.mubr.bf16.mxu0 %v2015_v12  ;;  %1233 = vmatprep.mubr.bf16.mxu1 %v2018_v13 }
 0x19d   : > { %1226 = vmatmul.mubr.bf16.gmra.mxu0 %v2025_v14  ;;  %1234 = vmatmul.mubr.bf16.gmra.mxu1 %v2028_v15 }
 0x255   : > { %v1223_v49 = vpop.f32.mrf.mxu0  ;;  %v1231_v50 = vpop.f32.mrf.mxu1 }
 0x256   : > { %v749_v51 = vadd.f32 %v1223_v49, %v1057_v48  ;;  %v781_v52 = vadd.f32 %v1231_v50, %v1057_v48 }
 0x257   : > { %v740_v53 = vpop.f32.mrf.mxu0  ;;  %v772_v54 = vpop.f32.mrf.mxu1 }
 0x258   : > { %805 = vst [vmem:[%s2047_s22 + $0x10] sm:$0xff] %v749_v51  ;;  %813 = vst [vmem:[%s2047_s22 + $0x50] sm:$0xff] %v781_v52  ;;  %v741_v55 = vadd.f32 %v1057_v48, %v740_v53  ;;  %v773_v56 = vadd.f32 %v1057_v48, %v772_v54 }
 0x259   : > { %v1224_v57 = vpop.f32.mrf.mxu0  ;;  %v1232_v58 = vpop.f32.mrf.mxu1 }
 0x25a   : > { %803 = vst [vmem:[%s2047_s22] sm:$0xff] %v741_v55  ;;  %811 = vst [vmem:[%s2047_s22 + $0x40] sm:$0xff] %v773_v56  ;;  %v752_v59 = vadd.f32 %v1224_v57, %v1057_v48  ;;  %v784_v60 = vadd.f32 %v1232_v58, %v1057_v48 }
 0x25b   : > { %v743_v61 = vpop.f32.mrf.mxu0  ;;  %v775_v62 = vpop.f32.mrf.mxu1 }
 0x25c   : > { %806 = vst [vmem:[%s2047_s22 + $0x18] sm:$0xff] %v752_v59  ;;  %814 = vst [vmem:[%s2047_s22 + $0x58] sm:$0xff] %v784_v60  ;;  %v744_v63 = vadd.f32 %v1057_v48, %v743_v61  ;;  %v776_v0 = vadd.f32 %v1057_v48, %v775_v62 }
 0x25d   : > { %v1227_v1 = vpop.f32.mrf.mxu0  ;;  %v1235_v2 = vpop.f32.mrf.mxu1 }
 0x25e   : > { %804 = vst [vmem:[%s2047_s22 + $0x8] sm:$0xff] %v744_v63  ;;  %812 = vst [vmem:[%s2047_s22 + $0x48] sm:$0xff] %v776_v0  ;;  %v765_v3 = vadd.f32 %v1227_v1, %v1057_v48  ;;  %v797_v4 = vadd.f32 %v1235_v2, %v1057_v48 }
 0x25f   : > { %v756_v5 = vpop.f32.mrf.mxu0  ;;  %v788_v6 = vpop.f32.mrf.mxu1 }
 0x260   : > { %809 = vst [vmem:[%s2047_s22 + $0x30] sm:$0xff] %v765_v3  ;;  %817 = vst [vmem:[%s2047_s22 + $0x70] sm:$0xff] %v797_v4  ;;  %v757_v7 = vadd.f32 %v1057_v48, %v756_v5  ;;  %v789_v8 = vadd.f32 %v1057_v48, %v788_v6 }
 0x261   : > { %v1228_v9 = vpop.f32.mrf.mxu0  ;;  %v1236_v10 = vpop.f32.mrf.mxu1 }
 0x262   : > { %807 = vst [vmem:[%s2047_s22 + $0x20] sm:$0xff] %v757_v7  ;;  %815 = vst [vmem:[%s2047_s22 + $0x60] sm:$0xff] %v789_v8  ;;  %v768_v11 = vadd.f32 %v1228_v9, %v1057_v48  ;;  %v800_v12 = vadd.f32 %v1236_v10, %v1057_v48 }
 0x263   : > { %v759_v13 = vpop.f32.mrf.mxu0  ;;  %v791_v14 = vpop.f32.mrf.mxu1 }
 0x264   : > { %810 = vst [vmem:[%s2047_s22 + $0x38] sm:$0xff] %v768_v11  ;;  %818 = vst [vmem:[%s2047_s22 + $0x78] sm:$0xff] %v800_v12  ;;  %v760_v15 = vadd.f32 %v1057_v48, %v759_v13  ;;  %v792_v16 = vadd.f32 %v1057_v48, %v791_v14 }
 0x266   : > { %808 = vst [vmem:[%s2047_s22 + $0x28] sm:$0xff] %v760_v15  ;;  %816 = vst [vmem:[%s2047_s22 + $0x68] sm:$0xff] %v792_v16 }
 0x267 PF: > { %s2281_s28 = sld [smem:[#allocation21_spill]]  ;;  %s840_s13 = sshll.u32 %s2035_s19, 4  ;;  %s2080_s13 = int_to_ptr.vmem [resolvable:$true] %s840_s13 }
 0x268   : > { %s2282_s9 = sld [smem:[#allocation20_spill]]  ;;  %s2089_s17 = scalar_lea.sflag [#allocation4], %s312_s2 }
 0x269   : > { %s2284_s14 = sld [smem:[#allocation25_spill]]  ;;  %s1528_s1 = scalar_lea.vmem %s2080_s13, 1024 }
 0x26a   : > { %s2285_s27 = sld [smem:[#allocation34_spill]]  ;;  %p1529_p6 = scmp.ne.s32.totalorder %s2080_s13, %s1528_s1 }
 0x26b   : > { %s1717_s19 = smov [#allocation8]  }
 0x26d   : > { %s1068_s5 = sshll.u32 %s2281_s28, 4 }
 0x26e   : > { %s1069_s18 = sshll.u32 %s2282_s9, 6  ;;  %s1532_s9 = sshll.u32 %s1717_s19, 4  ;;  %s1533_s9 = int_to_ptr.vmem [resolvable:$false] %s1532_s9 }
 0x26f   : > { %s837_s4 = sadd.s32 %s1069_s18, %s1068_s5  ;;  %p2287_p11 = scmp.ne.s32.totalorder %s2284_s14, 0 }
 0x270   : > { %s1070_s12 = sshll.u32 %s837_s4, 6  ;;  %s2286_s15 = smov %s2285_s27 }
 0x271   : > { %s2085_s21 = scalar_lea.hbm %s2285_s27, %s1070_s12  ;;  %p1530_p13 = pnand %p1529_p6, %p2287_p11 }
 0x272   : > { %s1534_s5 = scalar_lea.vmem %s1533_s9, 2048  ;;  %p1535_p7 = scmp.lt.s32.totalorder %s2080_s13, %s1533_s9 }
 0x273   : > { %p1531_p1 = pneg %p1530_p13  ;;  %p1536_p0 = scmp.lt.s32.totalorder %s1534_s5, %s1528_s1 }
 0x275   : > { %p1537_p3 = por %p1536_p0, %p1535_p7 }
 0x277   : > { %p1538_p10 = pnand %p1537_p3, %p1531_p1 }
 0x279   : > { %1541 = shalt.err (!%p1538_p10)
}
 0x27a   : > { %s1542_s2 = scalar_lea.hbm %s2085_s21, 1024  ;;  %s1546_s4 = scalar_lea.hbm %s2286_s15, 8192 }
 0x27b   : > { %p1543_p5 = scmp.ne.s32.totalorder %s2085_s21, %s1542_s2  ;;  %p1547_p9 = scmp.lt.s32.totalorder %s2085_s21, %s2286_s15 }
 0x27c   : > { %p1548_p4 = scmp.lt.s32.totalorder %s1546_s4, %s1542_s2 }
 0x27d   : > { %p1544_p2 = pnand %p1543_p5, %p2287_p11 }
 0x27e   : > { %p1549_p6 = por %p1548_p4, %p1547_p9 }
 0x27f   : > { %p1545_p8 = pneg %p1544_p2 }
 0x281   : > { %p1550_p13 = pnand %p1549_p6, %p1545_p8 }
 0x283   : > { %1553 = shalt.err (!%p1550_p13)
}
 0x284   : > { %s1718_s1 = smov 64   ;;  %s1719_s27 = smov 4  }
 0x285   : > { %1277 = dma.vmem_to_hbm [thread:$0]  (%p2287_p11), %s2080_s13, 1024, %s2085_s21, %s2089_s17, %s1718_s1, %s1718_s1, %s1719_s27  }
 0x286   : > { %s1093_s19 = sshll.u32 %s2281_s28, 11  ;;  %s2289_s10 = sld [smem:[#allocation35_spill]] }
 0x287   : > { %s856_s18 = sshll.u32 %s2047_s22, 4  ;;  %s825_s4 = scalar_lea.sflag [#allocation10], %s1969_s7  ;;  %s2119_s18 = int_to_ptr.vmem [resolvable:$true] %s856_s18 }
 0x288   : > { %s1554_s12 = scalar_lea.vmem %s2119_s18, 2048  ;;  %s1720_s14 = smov [#allocation9]  }
 0x289   : > { %p1555_p1 = scmp.ne.s32.totalorder %s2119_s18, %s1554_s12  ;;  %s1558_s13 = sshll.u32 %s1720_s14, 4  ;;  %s1559_s13 = int_to_ptr.vmem [resolvable:$false] %s1558_s13 }
 0x28a   : > { %s1560_s28 = scalar_lea.vmem %s1559_s13, 4096  ;;  %p1561_p11 = scmp.lt.s32.totalorder %s2119_s18, %s1559_s13 }
 0x28b   : > { %p1556_p7 = pnand %p1555_p1, %p1889_p12  ;;  %p1562_p3 = scmp.lt.s32.totalorder %s1560_s28, %s1554_s12 }
 0x28c   : > { %s2116_s2 = scalar_lea.hbm %s2289_s10, %s1093_s19 }
 0x28d   : > { %p1557_p0 = pneg %p1556_p7  ;;  %p1563_p10 = por %p1562_p3, %p1561_p11 }
 0x28f   : > { %p1564_p5 = pnand %p1563_p10, %p1557_p0 }
 0x291   : > { %1567 = shalt.err (!%p1564_p5)
}
 0x292   : > { %s1568_s22 = scalar_lea.hbm %s2116_s2, 2048  ;;  %s1572_s11 = scalar_lea.hbm %s2289_s10, 8192 }
 0x293   : > { %p1569_p2 = scmp.ne.s32.totalorder %s2116_s2, %s1568_s22  ;;  %p1573_p4 = scmp.lt.s32.totalorder %s2116_s2, %s2289_s10 }
 0x294   : > { %p1574_p6 = scmp.lt.s32.totalorder %s1572_s11, %s1568_s22 }
 0x295   : > { %p1570_p8 = pnand %p1569_p2, %p1889_p12 }
 0x296   : > { %p1575_p13 = por %p1574_p6, %p1573_p4 }
 0x297   : > { %p1571_p9 = pneg %p1570_p8 }
 0x299   : > { %p1576_p1 = pnand %p1575_p13, %p1571_p9 }
 0x29b   : > { %1579 = shalt.err (!%p1576_p1)
}
 0x29c   : > { %s1721_s19 = smov 128   ;;  %s1722_s9 = smov 8  }
 0x29d   : > { %1278 = dma.vmem_to_hbm [thread:$0]  (%p1889_p12), %s2119_s18, 2048, %s2116_s2, %s825_s4, %s1721_s19, %s1721_s19, %s1722_s9  }
 0x29e PF: > { %s2290_s5 = sld [smem:[#allocation16_spill]]  ;;  %p1302_p7 = scmp.ge.s32.totalorder %s1710_s6, 2 }
 0x29f   : > { %s2291_s12 = sld [smem:[#allocation26_spill]] }
 0x2a4   : > { %s871_s14 = sand.u32 1, %s2290_s5  }
 0x2a5   : > { %p2292_p0 = scmp.ne.s32.totalorder %s2291_s12, 0  ;;  %s872_s13 = scalar_lea.sflag [#allocation4], %s871_s14 }
 0x2a7   : > { %p1293_p11 = pnand %p1302_p7, %p2292_p0 }
 0x2a9   : > { %p1294_p3 = pneg %p1293_p11 }
 0x2ab   : > { %1649 = dma.done.wait (%p1294_p3), %s872_s13, 1024  }
 0x2ac   : > { %1651 = vsyncadd (%p1294_p3), %s872_s13, 4294966272  ;;  %s2293_s28 = sld [smem:[#allocation19_spill]] }
 0x2ad   : > { %s2294_s22 = sld [smem:[#allocation27_spill]] }
 0x2b2   : > { %s880_s21 = sand.u32 1, %s2293_s28  }
 0x2b3   : > { %p2295_p10 = scmp.ne.s32.totalorder %s2294_s22, 0  ;;  %s881_s7 = scalar_lea.sflag [#allocation10], %s880_s21 }
 0x2b5   : > { %p1296_p5 = pnand %p1302_p7, %p2295_p10 }
 0x2b7   : > { %p1297_p2 = pneg %p1296_p5 }
 0x2b9   : > { %1653 = dma.done.wait (%p1297_p2), %s881_s7, 2048  }
 0x2ba   : > { %1655 = vsyncadd (%p1297_p2), %s881_s7, 4294965248  ;;  %s28_s6 = sadd.s32 1, %s1710_s6   ;;  %s2297_s18 = sld [smem:[#allocation17_spill]] }
 0x2bb   : > { %p2152_p12 = scmp.ge.s32.totalorder %s28_s6, 10   ;;  %s2298_s21 = sld [smem:[#allocation18_spill]] }
 0x2bc   : > { %s2299_s2 = smov %s1942_s24  ;;  %s2300_s4 = sld [smem:[#allocation29_spill]] }
 0x2bd   : > { %s2301_s19 = smov %s1666_s20  ;;  %s2302_s20 = smov %s1945_s3 }
 0x2be   : > { %s2303_s22 = smov %s1678_s23  ;;  %s2304_s23 = smov %s1937_s16 }
 0x2bf   : > { %s2305_s24 = smov %s1686_s25  ;;  %s2306_s25 = smov %s1690_s26 }
 0x2c0   : > { %s2307_s26 = smov %s2299_s2  ;;  %s2308_s27 = smov %s1702_s29 }
 0x2c1   : > { %s2309_s28 = smov %s1706_s30  ;;  %s2311_s30 = smov %s2317_s8 }
 0x2c2   : > { %s2310_s29 = smov %s2300_s4  ;;  %27 = sbr.rel (!%p2152_p12) target bundleno = 21 (0x15), region = 119 }
 0x2c7   :  { %886 = vsyncpa [#allocation3], 1 }
 0x2c8   :  { %888 = vsyncpa [#allocation3 + $0x1], 1 }
 0x2c9   :  { %889 = vsyncpa [#allocation6], 1 }
 0x2ca   :  { %891 = vsyncpa [#allocation6 + $0x1], 1 }
 0x2cb   :  { %892 = vsyncpa [#allocation4], 1 }
 0x2cc   :  { %894 = vsyncpa [#allocation4 + $0x1], 1 }
 0x2cd   :  { %895 = vsyncpa [#allocation10], 1 }
 0x2ce   :  { %897 = vsyncpa [#allocation10 + $0x1], 1 }

</bundles_post_ra>
